<compile_context>
chip_gen: v7x
topology: tpu7x:2x2x1
jax: 0.10.0
libtpu: 0.0.40
codegen_flags: <defaults>
</compile_context>

<pallas_src>
import jax
import jax.numpy as jnp
import numpy as np
from jax.experimental import pallas as pl
from jax.experimental.pallas import tpu as pltpu

NUM_CLASSES = 200                    # nn.Conv2d(2048, 200, 1, bias=False)
CHANS = [3, 16, 32, 64, 128, 256]    # scaled-down stand-in for 3/64/.../2048

VMEM_TILE_BUDGET = 32 * 1024 * 1024  # working-set target for tile planning
VMEM_LIMIT_BYTES = 48 * 1024 * 1024  # <= ~48 MiB so it never faults on v7x


# ---------------------------------------------------------------------------
# Pallas kernel: fused CAM head for one spatial tile.
#   feat_ref: (2, TQ, C)  bf16  -- image 1's features already flipped along W
#   w_ref   : (C, Npad)   bf16  -- classifier weight, zero-padded to Npad=256
#   part_ref: (2, Npad)   f32   -- per-tile pre-ReLU score sums (logits branch)
#   cam_ref : (TQ, Npad)  bf16  -- relu(scores0) + relu(scores1_flipped)
# ---------------------------------------------------------------------------
def cam_head_kernel(feat_ref, w_ref, part_ref, cam_ref):
    f = feat_ref[...]                              # (2, TQ, C) bf16
    two, tq, c = f.shape

    # Single MXU push with M = 2*TQ (contiguous reshape, no data movement).
    scores = jnp.dot(f.reshape(two * tq, c), w_ref[...],
                     preferred_element_type=jnp.float32)       # (2*TQ, Npad) f32

    s0 = scores[:tq]                               # image 0 scores
    s1 = scores[tq:]                               # image 1 scores (pre-flipped feat)

    # CAM branch: relu(conv1x1(x4[0])) + relu(conv1x1(x4[1])).flip(W), bf16 store.
    cam_ref[...] = (jnp.maximum(s0, 0.0) + jnp.maximum(s1, 0.0)).astype(cam_ref.dtype)

    # Logits branch: GAP commutes with the 1x1 classifier -> emit per-tile
    # pre-ReLU score sums; the tiny reduction over tiles happens outside.
    part_ref[0:1, :] = jnp.sum(s0, axis=0, keepdims=True)
    part_ref[1:2, :] = jnp.sum(s1, axis=0, keepdims=True)


def _plan_tiles(hw, c, npad, budget=VMEM_TILE_BUDGET):
    """Pick (n_tiles, TQ) such that
       * n_tiles is even (v7x has 2 TensorCores -> balanced "parallel" split),
       * TQ is a multiple of 16 (bf16 sublane packing / (8,128) block rule),
       * the double-buffered working set fits `budget`,
       * TQ is as large as possible (amortize ~0.35 us/grid-step, keep the MXU
         M-dimension (= 2*TQ) large)."""
    def working_set(tq):
        feat = 2 * (2 * tq * c * 2)      # (2,TQ,C) bf16, double-buffered
        wgt  = 2 * (c * npad * 2)        # (C,Npad) bf16, double-buffered
        cam  = 2 * (tq * npad * 2)       # (TQ,Npad) bf16, double-buffered
        part = 2 * (2 * npad * 4)        # (2,Npad) f32, double-buffered
        return feat + wgt + cam + part

    n_tiles = 2
    while True:
        tq = -(-hw // n_tiles)                     # ceil
        tq = ((tq + 15) // 16) * 16                # sublane alignment (bf16)
        if working_set(tq) <= budget or tq <= 16:
            return n_tiles, tq
        n_tiles += 2


def cam_head(feat_nhwc, w_cn):
    """feat_nhwc: (2, H, W, C) bf16 features; w_cn: (C, N) f32 classifier.
    Returns logits (2, N) f32 and cam (N, H, W) f32."""
    B, H, W, C = feat_nhwc.shape
    assert B == 2, "CAM consumes an (image, flipped-image) pair"
    N = w_cn.shape[1]
    Npad = ((N + 127) // 128) * 128                # 200 -> 256: lane-dense stores
    HW = H * W
    n_tiles, TQ = _plan_tiles(HW, C, Npad)
    hw_pad = n_tiles * TQ

    # Flip image 1's features along W here (commutes with channel matmul+ReLU).
    # Backbone already emits bf16, so flip+stack+pad+reshape fuse into a single
    # bf16 producer copy (no extra f32 HBM pass).
    feat_bf16 = feat_nhwc.astype(jnp.bfloat16)
    feat_pair = jnp.stack([feat_bf16[0], jnp.flip(feat_bf16[1], axis=1)], axis=0)
    feat_flat = feat_pair.reshape(2, HW, C)
    if hw_pad != HW:
        # Zero rows: contribute 0 to logits partials, CAM rows sliced off below.
        feat_flat = jnp.pad(feat_flat, ((0, 0), (0, hw_pad - HW), (0, 0)))

    w_pad = jnp.zeros((C, Npad), jnp.bfloat16).at[:, :N].set(
        w_cn.astype(jnp.bfloat16))

    part, cam_flat = pl.pallas_call(
        cam_head_kernel,
        grid=(n_tiles,),
        in_specs=[
            pl.BlockSpec((2, TQ, C), lambda i: (0, i, 0)),
            # Constant block index -> weight DMA'd once, not refetched per step.
            pl.BlockSpec((C, Npad), lambda i: (0, 0)),
        ],
        out_specs=(
            pl.BlockSpec((None, 2, Npad), lambda i: (i, 0, 0)),
            pl.BlockSpec((TQ, Npad), lambda i: (i, 0)),
        ),
        out_shape=(
            jax.ShapeDtypeStruct((n_tiles, 2, Npad), jnp.float32),
            jax.ShapeDtypeStruct((hw_pad, Npad), jnp.bfloat16),
        ),
        compiler_params=pltpu.CompilerParams(
            dimension_semantics=("parallel",),
            vmem_limit_bytes=VMEM_LIMIT_BYTES,
        ),
    )(feat_flat, w_pad)

    logits = part.sum(axis=0)[:, :N] / float(HW)               # (2, N) f32
    cam = cam_flat[:HW, :N].astype(jnp.float32).reshape(H, W, N)
    cam = jnp.transpose(cam, (2, 0, 1))                        # PyTorch (N, H, W)
    return logits, cam


# ---------------------------------------------------------------------------
# Stand-in backbone (plain-JAX glue, NHWC so the kernel input is channel-last).
# TODO(synk): the pretrained ResNet-50 bottleneck stack (stage0..stage4) cannot
# be reproduced without a checkpoint; replaced by deterministic conv+BN+ReLU
# stages with the same stride pattern (output stride 16, strides=(2,2,2,1)).
# ---------------------------------------------------------------------------
def conv2d_nhwc(x, w_hwio, stride, pad):
    return jax.lax.conv_general_dilated(
        x, w_hwio, window_strides=(stride, stride),
        padding=[(pad, pad), (pad, pad)],
        dimension_numbers=("NHWC", "HWIO", "NHWC"))


def maxpool_nhwc(x, window=3, stride=2, pad=1):
    return jax.lax.reduce_window(
        x, -jnp.inf, jax.lax.max,
        window_dimensions=(1, window, window, 1),
        window_strides=(1, stride, stride, 1),
        padding=((0, 0), (pad, pad), (pad, pad), (0, 0)))


def init_params(key):
    ksizes = [7, 3, 3, 3, 3]
    keys = jax.random.split(key, 2 * len(ksizes) + 1)
    params = {}
    for s in range(5):
        cin, cout, ks = CHANS[s], CHANS[s + 1], ksizes[s]
        wk = jax.random.normal(keys[2 * s], (ks, ks, cin, cout), jnp.float32)
        wk = wk * (1.0 / np.sqrt(cin * ks * ks))
        scale = 1.0 + 0.1 * jax.random.normal(keys[2 * s + 1], (cout,), jnp.float32)
        bias = jnp.zeros((cout,), jnp.float32)
        params[f"stage{s}"] = (wk, scale, bias)
    # classifier = nn.Conv2d(C_feat, 200, 1, bias=False): weight (N, C, 1, 1)
    wc = jax.random.normal(keys[-1], (NUM_CLASSES, CHANS[-1], 1, 1), jnp.float32)
    params["classifier"] = wc * (1.0 / np.sqrt(CHANS[-1]))
    return params


def backbone(params, x_nhwc):
    strides = [2, 1, 2, 2, 1]   # conv1 s2 (+maxpool), layer strides (1,2,2,1)
    pads = [3, 1, 1, 1, 1]
    h = x_nhwc
    for s in range(5):
        w, scale, bias = params[f"stage{s}"]
        h = conv2d_nhwc(h, w, strides[s], pads[s])
        h = h * scale[None, None, None, :] + bias[None, None, None, :]
        h = jnp.maximum(h, 0.0)
        if s == 0:
            h = maxpool_nhwc(h)
    # Emit bf16 so the CAM-head producer copy (flip/stack/pad) is bf16-only.
    return h.astype(jnp.bfloat16)   # (B, H, W, C_feat)


# ---------------------------------------------------------------------------
# Full CAM.forward
# ---------------------------------------------------------------------------
def cam_forward(params, x_nchw):
    x_nhwc = jnp.transpose(x_nchw, (0, 2, 3, 1))          # tiny (3-channel) transpose
    feat = backbone(params, x_nhwc)                        # (B, H, W, C) bf16
    w_cn = jnp.transpose(params["classifier"][:, :, 0, 0], (1, 0))   # (C, N)
    logits, cam = cam_head(feat, w_cn)
    return logits, cam                                     # (2, 200), (200, H, W)


def cam_forward_ref(params, x_nchw):
    """Pure-JAX reference mirroring the PyTorch forward, with operands rounded
    to bf16 (f32 accumulation) to match the kernel's mixed-precision matmuls."""
    feat = backbone(params, jnp.transpose(x_nchw, (0, 2, 3, 1)))      # (B,H,W,C) bf16
    feat_r = feat.astype(jnp.float32)
    wc_r = params["classifier"][:, :, 0, 0].astype(jnp.bfloat16).astype(jnp.float32)
    x4 = jnp.einsum("bhwc,nc->bnhw", feat_r, wc_r,
                    precision=jax.lax.Precision.HIGHEST)              # 1x1 conv
    x4 = jnp.maximum(x4, 0.0)
    cam = x4[0] + jnp.flip(x4[1], axis=-1)                            # (N, H, W)
    gap = jnp.mean(feat_r, axis=(1, 2))                               # (B, C)
    cls = jnp.einsum("bc,nc->bn", gap, wc_r,
                     precision=jax.lax.Precision.HIGHEST)             # (B, N)
    return cls, cam


if __name__ == "__main__":
    key = jax.random.PRNGKey(0)
    pkey, xkey = jax.random.split(key)
    params = init_params(pkey)
    # CAM is fed a (image, flipped-image) pair -> batch = 2.
    # 256x256 input -> 16x16 feature map -> HW=256: tile planner picks
    # TQ=128 / n_tiles=2 (even split for v7x, MXU M=256 per push).
    x = jax.random.normal(xkey, (2, 3, 256, 256), jnp.float32)

    fwd = jax.jit(cam_forward)
    ref = jax.jit(cam_forward_ref)

    logits, cam = jax.block_until_ready(fwd(params, x))
    logits_ref, cam_ref = jax.block_until_ready(ref(params, x))

    assert logits.shape == (2, NUM_CLASSES) and cam.shape == (NUM_CLASSES, 16, 16)
    np.testing.assert_allclose(np.asarray(logits), np.asarray(logits_ref),
                               rtol=5e-3, atol=5e-3)
    # CAM is stored in bf16 by the kernel -> compare with bf16-level tolerance.
    np.testing.assert_allclose(np.asarray(cam), np.asarray(cam_ref),
                               rtol=1e-2, atol=1e-2)
    print("KERNEL_OK")
</pallas_src>

<mosaic_0001>
module attributes {stable_mosaic.version = 11 : i64} {
  func.func @cam_head_kernel(%arg0: i32, %arg1: memref<2x128x256xbf16, #tpu.memory_space<vmem>>, %arg2: memref<256x256xbf16, #tpu.memory_space<vmem>>, %arg3: memref<1x2x256xf32, #tpu.memory_space<vmem>>, %arg4: memref<128x256xbf16, #tpu.memory_space<vmem>>) attributes {dimension_semantics = [#tpu.dimension_semantics<parallel>], iteration_bounds = array<i64: 2>, scalar_prefetch = 0 : i64, scratch_operands = 0 : i64, tpu.core_type = #tpu.core_type<tc>, window_params = [{transform_indices = @transform_0, window_bounds = array<i64: 2, 128, 256>}, {pipeline_mode = #tpu.pipeline_mode<synchronous>, transform_indices = @transform_1, window_bounds = array<i64: 256, 256>}, {transform_indices = @transform_2, window_bounds = array<i64: 1, 2, 256>}, {transform_indices = @transform_3, window_bounds = array<i64: 128, 256>}]} {
    %c0 = arith.constant 0 : index
    %c0_0 = arith.constant 0 : index
    %c0_1 = arith.constant 0 : index
    %0 = vector.load %arg1[%c0, %c0_0, %c0_1] : memref<2x128x256xbf16, #tpu.memory_space<vmem>>, vector<2x128x256xbf16>
    %1 = vector.shape_cast %0 : vector<2x128x256xbf16> to vector<256x256xbf16>
    %c0_2 = arith.constant 0 : index
    %c0_3 = arith.constant 0 : index
    %2 = vector.load %arg2[%c0_2, %c0_3] : memref<256x256xbf16, #tpu.memory_space<vmem>>, vector<256x256xbf16>
    %cst = arith.constant dense<0.000000e+00> : vector<256x256xf32>
    %3 = tpu.matmul %1, %2, %cst {dimension_numbers = #tpu.dot_dimension_numbers<[1], [0], [0], [1], [0, 0, 1, 1], [], []>} : vector<256x256xbf16>, vector<256x256xbf16>, vector<256x256xf32> -> vector<256x256xf32>
    %4 = vector.extract_strided_slice %3 {offsets = [0, 0], sizes = [128, 256], strides = [1, 1]} : vector<256x256xf32> to vector<128x256xf32>
    %5 = vector.extract_strided_slice %3 {offsets = [128, 0], sizes = [128, 256], strides = [1, 1]} : vector<256x256xf32> to vector<128x256xf32>
    %cst_4 = arith.constant 0.000000e+00 : f32
    %6 = vector.broadcast %cst_4 : f32 to vector<128x256xf32>
    %7 = arith.maximumf %4, %6 : vector<128x256xf32>
    %cst_5 = arith.constant 0.000000e+00 : f32
    %8 = vector.broadcast %cst_5 : f32 to vector<128x256xf32>
    %9 = arith.maximumf %5, %8 : vector<128x256xf32>
    %10 = arith.addf %7, %9 : vector<128x256xf32>
    %11 = arith.truncf %10 : vector<128x256xf32> to vector<128x256xbf16>
    %c0_6 = arith.constant 0 : index
    %c0_7 = arith.constant 0 : index
    %12 = vector.load %arg4[%c0_6, %c0_7] : memref<128x256xbf16, #tpu.memory_space<vmem>>, vector<128x256xbf16>
    tpu.vector_store %arg4[%c0_6, %c0_7], %11 {strides = array<i32>} : memref<128x256xbf16, #tpu.memory_space<vmem>>, vector<128x256xbf16>,
    %cst_8 = arith.constant dense<0.000000e+00> : vector<256xf32>
    %13 = vector.multi_reduction <add>, %4, %cst_8 [0] : vector<128x256xf32> to vector<256xf32>
    %14 = vector.shape_cast %13 : vector<256xf32> to vector<1x256xf32>
    %c0_9 = arith.constant 0 : index
    %c0_10 = arith.constant 0 : index
    %c0_11 = arith.constant 0 : index
    %15 = vector.load %arg3[%c0_9, %c0_10, %c0_11] : memref<1x2x256xf32, #tpu.memory_space<vmem>>, vector<1x1x256xf32>
    %16 = vector.shape_cast %15 : vector<1x1x256xf32> to vector<1x256xf32>
    %17 = vector.shape_cast %14 : vector<1x256xf32> to vector<1x1x256xf32>
    tpu.vector_store %arg3[%c0_9, %c0_10, %c0_11], %17 {strides = array<i32>} : memref<1x2x256xf32, #tpu.memory_space<vmem>>, vector<1x1x256xf32>,
    %cst_12 = arith.constant dense<0.000000e+00> : vector<256xf32>
    %18 = vector.multi_reduction <add>, %5, %cst_12 [0] : vector<128x256xf32> to vector<256xf32>
    %19 = vector.shape_cast %18 : vector<256xf32> to vector<1x256xf32>
    %c0_13 = arith.constant 0 : index
    %c1 = arith.constant 1 : index
    %c0_14 = arith.constant 0 : index
    %20 = vector.load %arg3[%c0_13, %c1, %c0_14] : memref<1x2x256xf32, #tpu.memory_space<vmem>>, vector<1x1x256xf32>
    %21 = vector.shape_cast %20 : vector<1x1x256xf32> to vector<1x256xf32>
    %22 = vector.shape_cast %19 : vector<1x256xf32> to vector<1x1x256xf32>
    tpu.vector_store %arg3[%c0_13, %c1, %c0_14], %22 {strides = array<i32>} : memref<1x2x256xf32, #tpu.memory_space<vmem>>, vector<1x1x256xf32>,
    return
  }
  func.func @transform_0(%arg0: i32) -> (i32, i32, i32) {
    %c0_i32 = arith.constant 0 : i32
    %c0_i32_0 = arith.constant 0 : i32
    %c0_i32_1 = arith.constant 0 : i32
    return %c0_i32, %arg0, %c0_i32_0 : i32, i32, i32
  }
  func.func @transform_1(%arg0: i32) -> (i32, i32) {
    %c0_i32 = arith.constant 0 : i32
    %c0_i32_0 = arith.constant 0 : i32
    %c0_i32_1 = arith.constant 0 : i32
    return %c0_i32, %c0_i32_0 : i32, i32
  }
  func.func @transform_2(%arg0: i32) -> (i32, i32, i32) {
    %c0_i32 = arith.constant 0 : i32
    %c0_i32_0 = arith.constant 0 : i32
    %c0_i32_1 = arith.constant 0 : i32
    return %arg0, %c0_i32, %c0_i32_0 : i32, i32, i32
  }
  func.func @transform_3(%arg0: i32) -> (i32, i32) {
    %c0_i32 = arith.constant 0 : i32
    %c0_i32_0 = arith.constant 0 : i32
    return %arg0, %c0_i32 : i32, i32
  }
}

</mosaic_0001>

<bundles_post_ra>
// kernel: cam_forward.1
= control target key start
LH: loop header
LB: loop body
LE: loop exit
PB: predicated region body
PF: predicated region fallthrough
CT: control target
= control target key end

     0   :  { %s1673_s12 = smov 0   ;;  %s1675_s13 = smov 0   ;;  %s1947_s0 = inlined_call_operand.vmem [shape: bf16[2,256,256], index: 0, kind: input, shape index: {}]   ;;  %s1948_s1 = inlined_call_operand.vmem [shape: bf16[256,256], index: 1, kind: input, shape index: {}]   ;;  %s1949_s2 = inlined_call_operand.vmem [shape: f32[2,2,256], index: 2, kind: output, shape index: {0}]   ;;  %s1950_s3 = inlined_call_operand.vmem [shape: bf16[256,256], index: 3, kind: output, shape index: {1}]  }
   0x1   :  { %s1677_s14 = smov 0  }
   0x2 LB: > { %s1689_s15 = sadd.s32 4294967295, %s1650_s14   ;;  %s1692_s16 = sadd.s32 1, %s1650_s14   ;;  %s1650_s14 = sphi %s1677_s14, %s1953_s14   ;;  %s1646_s13 = sphi %s1675_s13, %s1952_s13   ;;  %s1642_s12 = sphi %s1673_s12, %s1951_s12  }
   0x3   : > { %s18_s17 = ssub.s32 %s1650_s14, %s1692_s16  ;;  %s21_s18 = sadd.s32 1, %s1646_s13 }
   0x4   : > { %p19_p0 = scmp.eq.s32.totalorder %s18_s17, 0  ;;  %p28_p1 = scmp.ne.s32.totalorder %s1646_s13, %s1642_s12 }
   0x5   : > { %p29_p2 = scmp.eq.s32.totalorder %s1650_s14, 0  ;;  %p1360_p4 = scmp.ge.s32.totalorder %s1650_s14, 2 }
   0x6   : > { %s1701_s19 = scalar_select %p19_p0, %s1646_s13, %s21_s18  }
   0x7   : > { %p30_p3 = por %p29_p2, %p28_p1  ;;  %130 = sbr.rel (%p1360_p4) target bundleno = 34 (0x22), region = 20 }
   0xe   : > { %133 = sbr.rel (!%p30_p3) target bundleno = 34 (0x22), region = 24  ;;  %s135_s20 = sand.u32 (%p30_p3), 1, %s1646_s13  }
   0xf   : > { %s1456_s21 = sshll.u32 (%p30_p3), %s1650_s14, 7  ;;  %s1361_s22 = sshll.u32 (%p30_p3), %s135_s20, 8 }
  0x10   : > { %s1709_s25 = scalar_lea.vmem (%p30_p3), %s1947_s0, %s1456_s21  ;;  %s1714_s26 = scalar_lea.vmem (%p30_p3), [#allocation2], %s1361_s22 }
  0x11   : > { %v231_v0 = vld [vmem:[%s1709_s25] sm:$0xff] (%p30_p3)  ;;  %v233_v1 = vld [vmem:[%s1709_s25 + $0x8] sm:$0xff] (%p30_p3)  ;;  %v235_v2 = vld [vmem:[%s1709_s25 + $0x10] sm:$0xff] (%p30_p3) }
  0x12   : > { %232 = vst [vmem:[%s1714_s26] sm:$0xff] (%p30_p3), %v231_v0  ;;  %234 = vst [vmem:[%s1714_s26 + $0x8] sm:$0xff] (%p30_p3), %v233_v1  ;;  %v237_v3 = vld [vmem:[%s1709_s25 + $0x18] sm:$0xff] (%p30_p3)  ;;  %v239_v4 = vld [vmem:[%s1709_s25 + $0x20] sm:$0xff] (%p30_p3) }
  0x13   : > { %236 = vst [vmem:[%s1714_s26 + $0x10] sm:$0xff] (%p30_p3), %v235_v2  ;;  %v241_v5 = vld [vmem:[%s1709_s25 + $0x28] sm:$0xff] (%p30_p3)  ;;  %238 = vst [vmem:[%s1714_s26 + $0x18] sm:$0xff] (%p30_p3), %v237_v3  ;;  %v243_v6 = vld [vmem:[%s1709_s25 + $0x30] sm:$0xff] (%p30_p3) }
  0x14   : > { %240 = vst [vmem:[%s1714_s26 + $0x20] sm:$0xff] (%p30_p3), %v239_v4  ;;  %242 = vst [vmem:[%s1714_s26 + $0x28] sm:$0xff] (%p30_p3), %v241_v5  ;;  %v245_v7 = vld [vmem:[%s1709_s25 + $0x38] sm:$0xff] (%p30_p3)  ;;  %v247_v8 = vld [vmem:[%s1709_s25 + $0x40] sm:$0xff] (%p30_p3) }
  0x15   : > { %244 = vst [vmem:[%s1714_s26 + $0x30] sm:$0xff] %v243_v6  ;;  %246 = vst [vmem:[%s1714_s26 + $0x38] sm:$0xff] %v245_v7  ;;  %v249_v9 = vld [vmem:[%s1709_s25 + $0x48] sm:$0xff]  ;;  %v251_v10 = vld [vmem:[%s1709_s25 + $0x50] sm:$0xff] }
  0x16   : > { %248 = vst [vmem:[%s1714_s26 + $0x40] sm:$0xff] %v247_v8  ;;  %v253_v11 = vld [vmem:[%s1709_s25 + $0x58] sm:$0xff]  ;;  %250 = vst [vmem:[%s1714_s26 + $0x48] sm:$0xff] %v249_v9  ;;  %v255_v12 = vld [vmem:[%s1709_s25 + $0x60] sm:$0xff] }
  0x17   : > { %252 = vst [vmem:[%s1714_s26 + $0x50] sm:$0xff] %v251_v10  ;;  %254 = vst [vmem:[%s1714_s26 + $0x58] sm:$0xff] %v253_v11  ;;  %v257_v13 = vld [vmem:[%s1709_s25 + $0x68] sm:$0xff]  ;;  %v259_v14 = vld [vmem:[%s1709_s25 + $0x70] sm:$0xff] }
  0x18   : > { %256 = vst [vmem:[%s1714_s26 + $0x60] sm:$0xff] %v255_v12  ;;  %258 = vst [vmem:[%s1714_s26 + $0x68] sm:$0xff] %v257_v13  ;;  %v261_v15 = vld [vmem:[%s1709_s25 + $0x78] sm:$0xff]  ;;  %v263_v16 = vld [vmem:[%s1709_s25 + $0x100] sm:$0xff] }
  0x19   : > { %260 = vst [vmem:[%s1714_s26 + $0x70] sm:$0xff] %v259_v14  ;;  %v265_v17 = vld [vmem:[%s1709_s25 + $0x108] sm:$0xff]  ;;  %262 = vst [vmem:[%s1714_s26 + $0x78] sm:$0xff] %v261_v15  ;;  %v267_v18 = vld [vmem:[%s1709_s25 + $0x110] sm:$0xff] }
  0x1a   : > { %264 = vst [vmem:[%s1714_s26 + $0x80] sm:$0xff] %v263_v16  ;;  %266 = vst [vmem:[%s1714_s26 + $0x88] sm:$0xff] %v265_v17  ;;  %v269_v19 = vld [vmem:[%s1709_s25 + $0x118] sm:$0xff]  ;;  %v271_v20 = vld [vmem:[%s1709_s25 + $0x120] sm:$0xff] }
  0x1b   : > { %268 = vst [vmem:[%s1714_s26 + $0x90] sm:$0xff] %v267_v18  ;;  %270 = vst [vmem:[%s1714_s26 + $0x98] sm:$0xff] %v269_v19  ;;  %v273_v21 = vld [vmem:[%s1709_s25 + $0x128] sm:$0xff]  ;;  %v275_v22 = vld [vmem:[%s1709_s25 + $0x130] sm:$0xff] }
  0x1c   : > { %272 = vst [vmem:[%s1714_s26 + $0xa0] sm:$0xff] %v271_v20  ;;  %v277_v23 = vld [vmem:[%s1709_s25 + $0x138] sm:$0xff]  ;;  %274 = vst [vmem:[%s1714_s26 + $0xa8] sm:$0xff] %v273_v21  ;;  %v279_v24 = vld [vmem:[%s1709_s25 + $0x140] sm:$0xff] }
  0x1d   : > { %276 = vst [vmem:[%s1714_s26 + $0xb0] sm:$0xff] %v275_v22  ;;  %278 = vst [vmem:[%s1714_s26 + $0xb8] sm:$0xff] %v277_v23  ;;  %v281_v25 = vld [vmem:[%s1709_s25 + $0x148] sm:$0xff]  ;;  %v283_v26 = vld [vmem:[%s1709_s25 + $0x150] sm:$0xff] }
  0x1e   : > { %280 = vst [vmem:[%s1714_s26 + $0xc0] sm:$0xff] %v279_v24  ;;  %282 = vst [vmem:[%s1714_s26 + $0xc8] sm:$0xff] %v281_v25  ;;  %v285_v27 = vld [vmem:[%s1709_s25 + $0x158] sm:$0xff]  ;;  %v287_v28 = vld [vmem:[%s1709_s25 + $0x160] sm:$0xff] }
  0x1f   : > { %284 = vst [vmem:[%s1714_s26 + $0xd0] sm:$0xff] %v283_v26  ;;  %v289_v29 = vld [vmem:[%s1709_s25 + $0x168] sm:$0xff]  ;;  %286 = vst [vmem:[%s1714_s26 + $0xd8] sm:$0xff] %v285_v27  ;;  %v291_v30 = vld [vmem:[%s1709_s25 + $0x170] sm:$0xff] }
  0x20   : > { %288 = vst [vmem:[%s1714_s26 + $0xe0] sm:$0xff] %v287_v28  ;;  %290 = vst [vmem:[%s1714_s26 + $0xe8] sm:$0xff] %v289_v29  ;;  %v293_v31 = vld [vmem:[%s1709_s25 + $0x178] sm:$0xff] }
  0x21   : > { %292 = vst [vmem:[%s1714_s26 + $0xf0] sm:$0xff] %v291_v30  ;;  %294 = vst [vmem:[%s1714_s26 + $0xf8] sm:$0xff] %v293_v31 }
  0x22 PF: > { %p1365_p5 = scmp.ge.s32.totalorder %s1650_s14, 1  ;;  %p299_p6 = scmp.lt.s32.totalorder %s1650_s14, 3 }
  0x24   : > { %p300_p7 = pnand %p1365_p5, %p299_p6 }
  0x25   : > { %v1532_v32 = vld [vmem:[%s1948_s1 + $0x4] ss:$8 sps:$4 sm:$0xff] (!%p300_p7)   ;;  %v1534_v33 = vld [vmem:[%s1948_s1] ss:$8 sps:$4 sm:$0xff] (!%p300_p7)   ;;  %v1535_v34 = vld [vmem:[%s1948_s1 + $0x14] ss:$8 sps:$4 sm:$0xff] (!%p300_p7)  }
  0x26   : > { %303 = sbr.rel (%p300_p7) target bundleno = 395 (0x18b), region = 62  ;;  %732 = vmatprep.subr.bf16.mxu0 (!%p300_p7), %v1532_v32  ;;  %1475 = vmatprep.subr.bf16.mxu1 (!%p300_p7), %v1532_v32  ;;  %v1537_v35 = vld [vmem:[%s1948_s1 + $0x10] ss:$8 sps:$4 sm:$0xff] (!%p300_p7)   ;;  %v1538_v36 = vld [vmem:[%s1948_s1 + $0x24] ss:$8 sps:$4 sm:$0xff] (!%p300_p7)   ;;  %s306_s23 = sand.u32 (!%p300_p7), 1, %s1642_s12  }
  0x27   : > { %733 = vmatpush1.bf16.msra.mxu0 (!%p300_p7), %v1534_v33  ;;  %1491 = vmatpush1.bf16.msra.mxu1 (!%p300_p7), %v1534_v33  ;;  %v1540_v37 = vld [vmem:[%s1948_s1 + $0x20] ss:$8 sps:$4 sm:$0xff] (!%p300_p7)   ;;  %v1541_v38 = vld [vmem:[%s1948_s1 + $0x34] ss:$8 sps:$4 sm:$0xff] (!%p300_p7)   ;;  %v1543_v39 = vld [vmem:[%s1948_s1 + $0x30] ss:$8 sps:$4 sm:$0xff] (!%p300_p7)  }
  0x28   : > { %734 = vmatprep.subr.bf16.mxu0 (!%p300_p7), %v1535_v34  ;;  %1476 = vmatprep.subr.bf16.mxu1 (!%p300_p7), %v1535_v34  ;;  %v1544_v40 = vld [vmem:[%s1948_s1 + $0x44] ss:$8 sps:$4 sm:$0xff] (!%p300_p7)   ;;  %v1546_v41 = vld [vmem:[%s1948_s1 + $0x40] ss:$8 sps:$4 sm:$0xff] (!%p300_p7)   ;;  %v1547_v42 = vld [vmem:[%s1948_s1 + $0x54] ss:$8 sps:$4 sm:$0xff] (!%p300_p7)  }
  0x29   : > { %s1366_s28 = sshll.u32 (!%p300_p7), %s306_s23, 8  ;;  %v1549_v43 = vld [vmem:[%s1948_s1 + $0x50] ss:$8 sps:$4 sm:$0xff] (!%p300_p7)   ;;  %v1550_v44 = vld [vmem:[%s1948_s1 + $0x64] ss:$8 sps:$4 sm:$0xff] (!%p300_p7)   ;;  %s1369_s27 = sshll.u32 (!%p300_p7), %s1689_s15, 4 }
  0x2a   : > { %s1819_s5 = scalar_lea.vmem (!%p300_p7), [#allocation2], %s1366_s28  ;;  %v1552_v46 = vld [vmem:[%s1948_s1 + $0x60] ss:$8 sps:$4 sm:$0xff] (!%p300_p7)   ;;  %v1553_v48 = vld [vmem:[%s1948_s1 + $0x74] ss:$8 sps:$4 sm:$0xff] (!%p300_p7)   ;;  %p342_p8 = scmp.lt.s32.totalorder (!%p300_p7), %s1369_s27, 31 }
  0x2b   : > { %735 = vmatpush1.bf16.msra.mxu0 (!%p300_p7), %v1537_v35  ;;  %1492 = vmatpush1.bf16.msra.mxu1 (!%p300_p7), %v1537_v35  ;;  %v1582_v45 = vld [vmem:[%s1819_s5 + $0x4] ss:$8 sps:$4 sm:$0xff] (!%p300_p7)   ;;  %v1555_v49 = vld [vmem:[%s1948_s1 + $0x70] ss:$8 sps:$4 sm:$0xff] (!%p300_p7)   ;;  %v1558_v51 = vld [vmem:[%s1948_s1 + $0x80] ss:$8 sps:$4 sm:$0xff] (!%p300_p7)  }
  0x2c   : > { %736 = vmatprep.subr.bf16.mxu0 (!%p300_p7), %v1538_v36  ;;  %1477 = vmatprep.subr.bf16.mxu1 (!%p300_p7), %v1538_v36  ;;  %v1585_v47 = vld [vmem:[%s1819_s5 + $0x84] ss:$8 sps:$4 sm:$0xff] (!%p300_p7)   ;;  %v1559_v52 = vld [vmem:[%s1948_s1 + $0x94] ss:$8 sps:$4 sm:$0xff] (!%p300_p7)   ;;  %v1561_v53 = vld [vmem:[%s1948_s1 + $0x90] ss:$8 sps:$4 sm:$0xff] (!%p300_p7)  }
  0x2d   : > { %764 = vmatprep.mubr.bf16.mxu0 %v1582_v45  ;;  %844 = vmatprep.mubr.bf16.mxu1 %v1585_v47  ;;  %v1556_v50 = vld [vmem:[%s1948_s1 + $0x84] ss:$8 sps:$4 sm:$0xff]   ;;  %v1564_v55 = vld [vmem:[%s1948_s1 + $0xa0] ss:$8 sps:$4 sm:$0xff]   ;;  %v1565_v56 = vld [vmem:[%s1948_s1 + $0xb4] ss:$8 sps:$4 sm:$0xff]  }
  0x2e   : > { %v1562_v54 = vld [vmem:[%s1948_s1 + $0xa4] ss:$8 sps:$4 sm:$0xff]   ;;  %v1567_v57 = vld [vmem:[%s1948_s1 + $0xb0] ss:$8 sps:$4 sm:$0xff]   ;;  %v1570_v59 = vld [vmem:[%s1948_s1 + $0xc0] ss:$8 sps:$4 sm:$0xff]  }
  0x2f   : > { %737 = vmatpush1.bf16.msra.mxu0 %v1540_v37  ;;  %1493 = vmatpush1.bf16.msra.mxu1 %v1540_v37  ;;  %v1568_v58 = vld [vmem:[%s1948_s1 + $0xc4] ss:$8 sps:$4 sm:$0xff]   ;;  %v1571_v60 = vld [vmem:[%s1948_s1 + $0xd4] ss:$8 sps:$4 sm:$0xff]   ;;  %v1573_v61 = vld [vmem:[%s1948_s1 + $0xd0] ss:$8 sps:$4 sm:$0xff]  }
  0x30   : > { %738 = vmatprep.subr.bf16.mxu0 %v1541_v38  ;;  %1478 = vmatprep.subr.bf16.mxu1 %v1541_v38  ;;  %v1574_v62 = vld [vmem:[%s1948_s1 + $0xe4] ss:$8 sps:$4 sm:$0xff]   ;;  %v1576_v63 = vld [vmem:[%s1948_s1 + $0xe0] ss:$8 sps:$4 sm:$0xff]   ;;  %v1577_v0 = vld [vmem:[%s1948_s1 + $0xf4] ss:$8 sps:$4 sm:$0xff]  }
  0x31   : > { %v1579_v1 = vld [vmem:[%s1948_s1 + $0xf0] ss:$8 sps:$4 sm:$0xff]   ;;  %v1580_v2 = vld [vmem:[%s1819_s5] ss:$8 sps:$4 sm:$0xff]   ;;  %v1586_v4 = vld [vmem:[%s1819_s5 + $0x14] ss:$8 sps:$4 sm:$0xff]  }
  0x32   : > { %v1583_v3 = vld [vmem:[%s1819_s5 + $0x80] ss:$8 sps:$4 sm:$0xff]   ;;  %v1588_v5 = vld [vmem:[%s1819_s5 + $0x94] ss:$8 sps:$4 sm:$0xff]   ;;  %v1590_v6 = vld [vmem:[%s1819_s5 + $0x10] ss:$8 sps:$4 sm:$0xff]  }
  0x33   : > { %739 = vmatpush1.bf16.msra.mxu0 %v1543_v39  ;;  %1494 = vmatpush1.bf16.msra.mxu1 %v1543_v39  ;;  %v1591_v7 = vld [vmem:[%s1819_s5 + $0x90] ss:$8 sps:$4 sm:$0xff]   ;;  %v1592_v8 = vld [vmem:[%s1819_s5 + $0x24] ss:$8 sps:$4 sm:$0xff]   ;;  %v1596_v10 = vld [vmem:[%s1819_s5 + $0x20] ss:$8 sps:$4 sm:$0xff]  }
  0x34   : > { %740 = vmatprep.subr.bf16.mxu0 %v1544_v40  ;;  %1479 = vmatprep.subr.bf16.mxu1 %v1544_v40  ;;  %v1594_v9 = vld [vmem:[%s1819_s5 + $0xa4] ss:$8 sps:$4 sm:$0xff]   ;;  %v1597_v11 = vld [vmem:[%s1819_s5 + $0xa0] ss:$8 sps:$4 sm:$0xff]   ;;  %v1598_v12 = vld [vmem:[%s1819_s5 + $0x34] ss:$8 sps:$4 sm:$0xff]  }
  0x35   : > { %v1600_v13 = vld [vmem:[%s1819_s5 + $0xb4] ss:$8 sps:$4 sm:$0xff]   ;;  %v1602_v14 = vld [vmem:[%s1819_s5 + $0x30] ss:$8 sps:$4 sm:$0xff]   ;;  %v1604_v16 = vld [vmem:[%s1819_s5 + $0x44] ss:$8 sps:$4 sm:$0xff]  }
  0x36   : > { %v1603_v15 = vld [vmem:[%s1819_s5 + $0xb0] ss:$8 sps:$4 sm:$0xff]   ;;  %v1606_v17 = vld [vmem:[%s1819_s5 + $0xc4] ss:$8 sps:$4 sm:$0xff]   ;;  %v1608_v18 = vld [vmem:[%s1819_s5 + $0x40] ss:$8 sps:$4 sm:$0xff]  }
  0x37   : > { %741 = vmatpush1.bf16.msra.mxu0 %v1546_v41  ;;  %1495 = vmatpush1.bf16.msra.mxu1 %v1546_v41  ;;  %v1609_v19 = vld [vmem:[%s1819_s5 + $0xc0] ss:$8 sps:$4 sm:$0xff]   ;;  %v1610_v20 = vld [vmem:[%s1819_s5 + $0x54] ss:$8 sps:$4 sm:$0xff]   ;;  %v1614_v22 = vld [vmem:[%s1819_s5 + $0x50] ss:$8 sps:$4 sm:$0xff]  }
  0x38   : > { %742 = vmatprep.subr.bf16.mxu0 %v1547_v42  ;;  %1480 = vmatprep.subr.bf16.mxu1 %v1547_v42  ;;  %v1612_v21 = vld [vmem:[%s1819_s5 + $0xd4] ss:$8 sps:$4 sm:$0xff]   ;;  %v1615_v23 = vld [vmem:[%s1819_s5 + $0xd0] ss:$8 sps:$4 sm:$0xff]   ;;  %v1616_v24 = vld [vmem:[%s1819_s5 + $0x64] ss:$8 sps:$4 sm:$0xff]  }
  0x39   : > { %v1618_v25 = vld [vmem:[%s1819_s5 + $0xe4] ss:$8 sps:$4 sm:$0xff]   ;;  %v1620_v26 = vld [vmem:[%s1819_s5 + $0x60] ss:$8 sps:$4 sm:$0xff]   ;;  %v1622_v28 = vld [vmem:[%s1819_s5 + $0x74] ss:$8 sps:$4 sm:$0xff]  }
  0x3a   : > { %v1621_v27 = vld [vmem:[%s1819_s5 + $0xe0] ss:$8 sps:$4 sm:$0xff]   ;;  %v1624_v29 = vld [vmem:[%s1819_s5 + $0xf4] ss:$8 sps:$4 sm:$0xff]   ;;  %v1626_v30 = vld [vmem:[%s1819_s5 + $0x70] ss:$8 sps:$4 sm:$0xff]  }
  0x3b   : > { %743 = vmatpush1.bf16.msra.mxu0 %v1549_v43  ;;  %1496 = vmatpush1.bf16.msra.mxu1 %v1549_v43  ;;  %v1627_v31 = vld [vmem:[%s1819_s5 + $0xf0] ss:$8 sps:$4 sm:$0xff]   ;;  %s1955_s27 = smov (!%p342_p8, %s1369_s27), 31  ;;  %p336_p9 = scmp.lt.s32.totalorder %s1689_s15, 1 }
  0x3c   : > { %744 = vmatprep.subr.bf16.mxu0 %v1550_v44  ;;  %1481 = vmatprep.subr.bf16.mxu1 %v1550_v44  ;;  %s1458_s28 = sshll.u32 %s1955_s27, 3 }
  0x3d   : > { %s1914_s30 = scalar_lea.vmem %s1950_s3, %s1458_s28  ;;  %s1957_s15 = smov (!%p336_p9, %s1689_s15), 1 }
  0x3e   : > { %s1457_s12 = sshll.u32 %s1957_s15, 2 }
  0x3f   : > { %745 = vmatpush1.bf16.msra.mxu0 %v1552_v46  ;;  %1497 = vmatpush1.bf16.msra.mxu1 %v1552_v46  ;;  %s340_s7 = scalar_lea.vmem %s1949_s2, %s1457_s12 }
  0x40   : > { %746 = vmatprep.subr.bf16.mxu0 %v1553_v48  ;;  %1482 = vmatprep.subr.bf16.mxu1 %v1553_v48 }
  0x43   : > { %747 = vmatpush1.bf16.msra.mxu0 %v1555_v49  ;;  %1498 = vmatpush1.bf16.msra.mxu1 %v1555_v49 }
  0x44   : > { %748 = vmatprep.subr.bf16.mxu0 %v1556_v50  ;;  %1483 = vmatprep.subr.bf16.mxu1 %v1556_v50 }
  0x47   : > { %749 = vmatpush1.bf16.msra.mxu0 %v1558_v51  ;;  %1499 = vmatpush1.bf16.msra.mxu1 %v1558_v51 }
  0x48   : > { %750 = vmatprep.subr.bf16.mxu0 %v1559_v52  ;;  %1484 = vmatprep.subr.bf16.mxu1 %v1559_v52 }
  0x4b   : > { %751 = vmatpush1.bf16.msra.mxu0 %v1561_v53  ;;  %1500 = vmatpush1.bf16.msra.mxu1 %v1561_v53 }
  0x4c   : > { %752 = vmatprep.subr.bf16.mxu0 %v1562_v54  ;;  %1485 = vmatprep.subr.bf16.mxu1 %v1562_v54 }
  0x4f   : > { %753 = vmatpush1.bf16.msra.mxu0 %v1564_v55  ;;  %1501 = vmatpush1.bf16.msra.mxu1 %v1564_v55 }
  0x50   : > { %754 = vmatprep.subr.bf16.mxu0 %v1565_v56  ;;  %1486 = vmatprep.subr.bf16.mxu1 %v1565_v56 }
  0x53   : > { %755 = vmatpush1.bf16.msra.mxu0 %v1567_v57  ;;  %1502 = vmatpush1.bf16.msra.mxu1 %v1567_v57 }
  0x54   : > { %756 = vmatprep.subr.bf16.mxu0 %v1568_v58  ;;  %1487 = vmatprep.subr.bf16.mxu1 %v1568_v58 }
  0x57   : > { %757 = vmatpush1.bf16.msra.mxu0 %v1570_v59  ;;  %1503 = vmatpush1.bf16.msra.mxu1 %v1570_v59 }
  0x58   : > { %758 = vmatprep.subr.bf16.mxu0 %v1571_v60  ;;  %1488 = vmatprep.subr.bf16.mxu1 %v1571_v60 }
  0x5b   : > { %759 = vmatpush1.bf16.msra.mxu0 %v1573_v61  ;;  %1504 = vmatpush1.bf16.msra.mxu1 %v1573_v61 }
  0x5c   : > { %760 = vmatprep.subr.bf16.mxu0 %v1574_v62  ;;  %1489 = vmatprep.subr.bf16.mxu1 %v1574_v62 }
  0x5f   : > { %761 = vmatpush1.bf16.msra.mxu0 %v1576_v63  ;;  %1505 = vmatpush1.bf16.msra.mxu1 %v1576_v63 }
  0x60   : > { %762 = vmatprep.subr.bf16.mxu0 %v1577_v0  ;;  %1490 = vmatprep.subr.bf16.mxu1 %v1577_v0 }
  0x63   : > { %763 = vmatpush1.bf16.msra.mxu0 %v1579_v1  ;;  %1506 = vmatpush1.bf16.msra.mxu1 %v1579_v1 }
  0x66   : > { %765 = vmatmul.mubr.bf16.vlgmr.msra.gmra.mrb[0].mxu0 %v1580_v2  ;;  %845 = vmatmul.mubr.bf16.vlgmr.msra.gmra.mrb[0].mxu1 %v1583_v3 }
  0x67   : > { %774 = vmatprep.mubr.bf16.mxu0 %v1586_v4  ;;  %854 = vmatprep.mubr.bf16.mxu1 %v1588_v5 }
  0x6e   : > { %775 = vmatmul.mubr.bf16.gmra.mrb[4].mxu0 %v1590_v6  ;;  %855 = vmatmul.mubr.bf16.gmra.mrb[4].mxu1 %v1591_v7 }
  0x6f   : > { %784 = vmatprep.mubr.bf16.mxu0 %v1592_v8  ;;  %864 = vmatprep.mubr.bf16.mxu1 %v1594_v9 }
  0x76   : > { %785 = vmatmul.mubr.bf16.gmra.mrb[8].mxu0 %v1596_v10  ;;  %865 = vmatmul.mubr.bf16.gmra.mrb[8].mxu1 %v1597_v11 }
  0x77   : > { %794 = vmatprep.mubr.bf16.mxu0 %v1598_v12  ;;  %874 = vmatprep.mubr.bf16.mxu1 %v1600_v13 }
  0x7e   : > { %795 = vmatmul.mubr.bf16.gmra.mrb[12].mxu0 %v1602_v14  ;;  %875 = vmatmul.mubr.bf16.gmra.mrb[12].mxu1 %v1603_v15 }
  0x7f   : > { %804 = vmatprep.mubr.bf16.mxu0 %v1604_v16  ;;  %884 = vmatprep.mubr.bf16.mxu1 %v1606_v17 }
  0x86   : > { %805 = vmatmul.mubr.bf16.gmra.mrb[16].mxu0 %v1608_v18  ;;  %885 = vmatmul.mubr.bf16.gmra.mrb[16].mxu1 %v1609_v19 }
  0x87   : > { %814 = vmatprep.mubr.bf16.mxu0 %v1610_v20  ;;  %894 = vmatprep.mubr.bf16.mxu1 %v1612_v21 }
  0x8e   : > { %815 = vmatmul.mubr.bf16.gmra.mrb[20].mxu0 %v1614_v22  ;;  %895 = vmatmul.mubr.bf16.gmra.mrb[20].mxu1 %v1615_v23 }
  0x8f   : > { %824 = vmatprep.mubr.bf16.mxu0 %v1616_v24  ;;  %904 = vmatprep.mubr.bf16.mxu1 %v1618_v25 }
  0x96   : > { %825 = vmatmul.mubr.bf16.gmra.mrb[24].mxu0 %v1620_v26  ;;  %905 = vmatmul.mubr.bf16.gmra.mrb[24].mxu1 %v1621_v27 }
  0x97   : > { %834 = vmatprep.mubr.bf16.mxu0 %v1622_v28  ;;  %914 = vmatprep.mubr.bf16.mxu1 %v1624_v29 }
  0x9e   : > { %835 = vmatmul.mubr.bf16.gmra.mrb[28].mxu0 %v1626_v30  ;;  %915 = vmatmul.mubr.bf16.gmra.mrb[28].mxu1 %v1627_v31 }
 0x139   : > { %v766_v32 = vpop.f32.mrb[0].mxu0  ;;  %v846_v33 = vpop.f32.mrb[0].mxu1 }
 0x13a   : > { %v925_v34 = vmax.f32 %v766_v32, 0.0  ;;  %v957_v35 = vmax.f32 %v846_v33, 0.0  ;;  %v768_v36 = vpop.f32.mrb[1].mxu0  ;;  %v848_v37 = vpop.f32.mrb[1].mxu1 }
 0x13b   : > { %v926_v38 = vmax.f32 %v768_v36, 0.0  ;;  %v958_v39 = vmax.f32 %v848_v37, 0.0  ;;  %v770_v40 = vpop.f32.mrb[2].mxu0  ;;  %v850_v41 = vpop.f32.mrb[2].mxu1 }
 0x13c   : > { %v989_v42 = vadd.f32 %v957_v35, %v925_v34  ;;  %v927_v43 = vmax.f32 %v770_v40, 0.0  ;;  %v1133_v44 = vadd.f32 %v770_v40, %v766_v32  ;;  %v959_v45 = vmax.f32 %v850_v41, 0.0  ;;  %v772_v46 = vpop.f32.mrb[3].mxu0  ;;  %v852_v47 = vpop.f32.mrb[3].mxu1 }
 0x13d   : > { %v990_v48 = vadd.f32 %v958_v39, %v926_v38  ;;  %v1198_v49 = vadd.f32 %v850_v41, %v846_v33  ;;  %v928_v50 = vmax.f32 %v772_v46, 0.0  ;;  %v1154_v51 = vadd.f32 %v772_v46, %v768_v36 }
 0x13e   : > { %v991_v52 = vadd.f32 %v959_v45, %v927_v43  ;;  %v960_v53 = vmax.f32 %v852_v47, 0.0  ;;  %v1219_v54 = vadd.f32 %v852_v47, %v848_v37 }
 0x13f   : > { %v1459_v55 = vpack.c.bf16 %v990_v48, %v989_v42 }
 0x140   : > { %v992_v56 = vadd.f32 %v960_v53, %v928_v50 }
 0x141   : > { %1117 = vst [vmem:[%s1914_s30] sm:$0xff] %v1459_v55  ;;  %v776_v57 = vpop.f32.mrb[4].mxu0  ;;  %v856_v58 = vpop.f32.mrb[4].mxu1 }
 0x142   : > { %v1460_v59 = vpack.c.bf16 %v992_v56, %v991_v52  ;;  %v929_v60 = vmax.f32 %v776_v57, 0.0  ;;  %v1134_v61 = vadd.f32 %v1133_v44, %v776_v57  ;;  %v961_v62 = vmax.f32 %v856_v58, 0.0  ;;  %v778_v63 = vpop.f32.mrb[5].mxu0  ;;  %v858_v0 = vpop.f32.mrb[5].mxu1 }
 0x143   : > { %v1199_v1 = vadd.f32 %v1198_v49, %v856_v58  ;;  %v930_v2 = vmax.f32 %v778_v63, 0.0  ;;  %v1155_v3 = vadd.f32 %v1154_v51, %v778_v63  ;;  %v962_v4 = vmax.f32 %v858_v0, 0.0  ;;  %v780_v5 = vpop.f32.mrb[6].mxu0  ;;  %v860_v6 = vpop.f32.mrb[6].mxu1 }
 0x144   : > { %1118 = vst [vmem:[%s1914_s30 + $0x8] sm:$0xff] %v1460_v59  ;;  %v993_v7 = vadd.f32 %v961_v62, %v929_v60  ;;  %v1220_v8 = vadd.f32 %v1219_v54, %v858_v0  ;;  %v931_v9 = vmax.f32 %v780_v5, 0.0  ;;  %v1135_v10 = vadd.f32 %v1134_v61, %v780_v5  ;;  %v782_v11 = vpop.f32.mrb[7].mxu0  ;;  %v862_v12 = vpop.f32.mrb[7].mxu1 }
 0x145   : > { %v994_v13 = vadd.f32 %v962_v4, %v930_v2  ;;  %v963_v14 = vmax.f32 %v860_v6, 0.0  ;;  %v1200_v15 = vadd.f32 %v1199_v1, %v860_v6  ;;  %v932_v16 = vmax.f32 %v782_v11, 0.0 }
 0x146   : > { %v1156_v17 = vadd.f32 %v1155_v3, %v782_v11  ;;  %v964_v18 = vmax.f32 %v862_v12, 0.0  ;;  %v1221_v19 = vadd.f32 %v1220_v8, %v862_v12 }
 0x147   : > { %v1461_v20 = vpack.c.bf16 %v994_v13, %v993_v7  ;;  %v995_v21 = vadd.f32 %v963_v14, %v931_v9 }
 0x148   : > { %v996_v22 = vadd.f32 %v964_v18, %v932_v16 }
 0x149   : > { %1119 = vst [vmem:[%s1914_s30 + $0x10] sm:$0xff] %v1461_v20  ;;  %v786_v23 = vpop.f32.mrb[8].mxu0  ;;  %v866_v24 = vpop.f32.mrb[8].mxu1 }
 0x14a   : > { %v1462_v25 = vpack.c.bf16 %v996_v22, %v995_v21  ;;  %v933_v26 = vmax.f32 %v786_v23, 0.0  ;;  %v1136_v27 = vadd.f32 %v1135_v10, %v786_v23  ;;  %v965_v28 = vmax.f32 %v866_v24, 0.0  ;;  %v788_v29 = vpop.f32.mrb[9].mxu0  ;;  %v868_v30 = vpop.f32.mrb[9].mxu1 }
 0x14b   : > { %v1201_v31 = vadd.f32 %v1200_v15, %v866_v24  ;;  %v934_v32 = vmax.f32 %v788_v29, 0.0  ;;  %v1157_v33 = vadd.f32 %v1156_v17, %v788_v29  ;;  %v966_v34 = vmax.f32 %v868_v30, 0.0  ;;  %v790_v35 = vpop.f32.mrb[10].mxu0  ;;  %v870_v36 = vpop.f32.mrb[10].mxu1 }
 0x14c   : > { %1120 = vst [vmem:[%s1914_s30 + $0x18] sm:$0xff] %v1462_v25  ;;  %v997_v37 = vadd.f32 %v965_v28, %v933_v26  ;;  %v1222_v38 = vadd.f32 %v1221_v19, %v868_v30  ;;  %v935_v39 = vmax.f32 %v790_v35, 0.0  ;;  %v1137_v40 = vadd.f32 %v1136_v27, %v790_v35  ;;  %v792_v41 = vpop.f32.mrb[11].mxu0  ;;  %v872_v42 = vpop.f32.mrb[11].mxu1 }
 0x14d   : > { %v998_v43 = vadd.f32 %v966_v34, %v934_v32  ;;  %v967_v44 = vmax.f32 %v870_v36, 0.0  ;;  %v1202_v45 = vadd.f32 %v1201_v31, %v870_v36  ;;  %v936_v46 = vmax.f32 %v792_v41, 0.0 }
 0x14e   : > { %v1158_v47 = vadd.f32 %v1157_v33, %v792_v41  ;;  %v968_v48 = vmax.f32 %v872_v42, 0.0  ;;  %v1223_v49 = vadd.f32 %v1222_v38, %v872_v42 }
 0x14f   : > { %v1463_v50 = vpack.c.bf16 %v998_v43, %v997_v37  ;;  %v999_v51 = vadd.f32 %v967_v44, %v935_v39 }
 0x150   : > { %v1000_v52 = vadd.f32 %v968_v48, %v936_v46 }
 0x151   : > { %1121 = vst [vmem:[%s1914_s30 + $0x20] sm:$0xff] %v1463_v50  ;;  %v796_v53 = vpop.f32.mrb[12].mxu0  ;;  %v876_v54 = vpop.f32.mrb[12].mxu1 }
 0x152   : > { %v1464_v55 = vpack.c.bf16 %v1000_v52, %v999_v51  ;;  %v937_v56 = vmax.f32 %v796_v53, 0.0  ;;  %v1138_v57 = vadd.f32 %v1137_v40, %v796_v53  ;;  %v969_v58 = vmax.f32 %v876_v54, 0.0  ;;  %v798_v59 = vpop.f32.mrb[13].mxu0  ;;  %v878_v60 = vpop.f32.mrb[13].mxu1 }
 0x153   : > { %v1203_v61 = vadd.f32 %v1202_v45, %v876_v54  ;;  %v938_v62 = vmax.f32 %v798_v59, 0.0  ;;  %v1159_v63 = vadd.f32 %v1158_v47, %v798_v59  ;;  %v970_v0 = vmax.f32 %v878_v60, 0.0  ;;  %v800_v1 = vpop.f32.mrb[14].mxu0  ;;  %v880_v2 = vpop.f32.mrb[14].mxu1 }
 0x154   : > { %1122 = vst [vmem:[%s1914_s30 + $0x28] sm:$0xff] %v1464_v55  ;;  %v1001_v3 = vadd.f32 %v969_v58, %v937_v56  ;;  %v1224_v4 = vadd.f32 %v1223_v49, %v878_v60  ;;  %v939_v5 = vmax.f32 %v800_v1, 0.0  ;;  %v1139_v6 = vadd.f32 %v1138_v57, %v800_v1  ;;  %v802_v7 = vpop.f32.mrb[15].mxu0  ;;  %v882_v8 = vpop.f32.mrb[15].mxu1 }
 0x155   : > { %v1002_v9 = vadd.f32 %v970_v0, %v938_v62  ;;  %v971_v10 = vmax.f32 %v880_v2, 0.0  ;;  %v1204_v11 = vadd.f32 %v1203_v61, %v880_v2  ;;  %v940_v12 = vmax.f32 %v802_v7, 0.0 }
 0x156   : > { %v1160_v13 = vadd.f32 %v1159_v63, %v802_v7  ;;  %v972_v14 = vmax.f32 %v882_v8, 0.0  ;;  %v1225_v15 = vadd.f32 %v1224_v4, %v882_v8 }
 0x157   : > { %v1465_v16 = vpack.c.bf16 %v1002_v9, %v1001_v3  ;;  %v1003_v17 = vadd.f32 %v971_v10, %v939_v5 }
 0x158   : > { %v1004_v18 = vadd.f32 %v972_v14, %v940_v12 }
 0x159   : > { %1123 = vst [vmem:[%s1914_s30 + $0x30] sm:$0xff] %v1465_v16  ;;  %v806_v19 = vpop.f32.mrb[16].mxu0  ;;  %v886_v20 = vpop.f32.mrb[16].mxu1 }
 0x15a   : > { %v1466_v21 = vpack.c.bf16 %v1004_v18, %v1003_v17  ;;  %v941_v22 = vmax.f32 %v806_v19, 0.0  ;;  %v1140_v23 = vadd.f32 %v1139_v6, %v806_v19  ;;  %v973_v24 = vmax.f32 %v886_v20, 0.0  ;;  %v808_v25 = vpop.f32.mrb[17].mxu0  ;;  %v888_v26 = vpop.f32.mrb[17].mxu1 }
 0x15b   : > { %v1205_v27 = vadd.f32 %v1204_v11, %v886_v20  ;;  %v942_v28 = vmax.f32 %v808_v25, 0.0  ;;  %v1161_v29 = vadd.f32 %v1160_v13, %v808_v25  ;;  %v974_v30 = vmax.f32 %v888_v26, 0.0  ;;  %v810_v31 = vpop.f32.mrb[18].mxu0  ;;  %v890_v32 = vpop.f32.mrb[18].mxu1 }
 0x15c   : > { %1124 = vst [vmem:[%s1914_s30 + $0x38] sm:$0xff] %v1466_v21  ;;  %v1005_v33 = vadd.f32 %v973_v24, %v941_v22  ;;  %v1226_v34 = vadd.f32 %v1225_v15, %v888_v26  ;;  %v943_v35 = vmax.f32 %v810_v31, 0.0  ;;  %v1141_v36 = vadd.f32 %v1140_v23, %v810_v31  ;;  %v812_v37 = vpop.f32.mrb[19].mxu0  ;;  %v892_v38 = vpop.f32.mrb[19].mxu1 }
 0x15d   : > { %v1006_v39 = vadd.f32 %v974_v30, %v942_v28  ;;  %v975_v40 = vmax.f32 %v890_v32, 0.0  ;;  %v1206_v41 = vadd.f32 %v1205_v27, %v890_v32  ;;  %v944_v42 = vmax.f32 %v812_v37, 0.0 }
 0x15e   : > { %v1162_v43 = vadd.f32 %v1161_v29, %v812_v37  ;;  %v976_v44 = vmax.f32 %v892_v38, 0.0  ;;  %v1227_v45 = vadd.f32 %v1226_v34, %v892_v38 }
 0x15f   : > { %v1467_v46 = vpack.c.bf16 %v1006_v39, %v1005_v33  ;;  %v1007_v47 = vadd.f32 %v975_v40, %v943_v35 }
 0x160   : > { %v1008_v48 = vadd.f32 %v976_v44, %v944_v42 }
 0x161   : > { %1125 = vst [vmem:[%s1914_s30 + $0x40] sm:$0xff] %v1467_v46  ;;  %v816_v49 = vpop.f32.mrb[20].mxu0  ;;  %v896_v50 = vpop.f32.mrb[20].mxu1 }
 0x162   : > { %v1468_v51 = vpack.c.bf16 %v1008_v48, %v1007_v47  ;;  %v945_v52 = vmax.f32 %v816_v49, 0.0  ;;  %v1142_v53 = vadd.f32 %v1141_v36, %v816_v49  ;;  %v977_v54 = vmax.f32 %v896_v50, 0.0  ;;  %v818_v55 = vpop.f32.mrb[21].mxu0  ;;  %v898_v56 = vpop.f32.mrb[21].mxu1 }
 0x163   : > { %v1207_v57 = vadd.f32 %v1206_v41, %v896_v50  ;;  %v946_v58 = vmax.f32 %v818_v55, 0.0  ;;  %v1163_v59 = vadd.f32 %v1162_v43, %v818_v55  ;;  %v978_v60 = vmax.f32 %v898_v56, 0.0  ;;  %v820_v61 = vpop.f32.mrb[22].mxu0  ;;  %v900_v62 = vpop.f32.mrb[22].mxu1 }
 0x164   : > { %1126 = vst [vmem:[%s1914_s30 + $0x48] sm:$0xff] %v1468_v51  ;;  %v1009_v63 = vadd.f32 %v977_v54, %v945_v52  ;;  %v1228_v0 = vadd.f32 %v1227_v45, %v898_v56  ;;  %v947_v1 = vmax.f32 %v820_v61, 0.0  ;;  %v1143_v2 = vadd.f32 %v1142_v53, %v820_v61  ;;  %v822_v3 = vpop.f32.mrb[23].mxu0  ;;  %v902_v4 = vpop.f32.mrb[23].mxu1 }
 0x165   : > { %v1010_v5 = vadd.f32 %v978_v60, %v946_v58  ;;  %v979_v6 = vmax.f32 %v900_v62, 0.0  ;;  %v1208_v7 = vadd.f32 %v1207_v57, %v900_v62  ;;  %v948_v8 = vmax.f32 %v822_v3, 0.0 }
 0x166   : > { %v1164_v9 = vadd.f32 %v1163_v59, %v822_v3  ;;  %v980_v10 = vmax.f32 %v902_v4, 0.0  ;;  %v1229_v11 = vadd.f32 %v1228_v0, %v902_v4 }
 0x167   : > { %v1469_v12 = vpack.c.bf16 %v1010_v5, %v1009_v63  ;;  %v1011_v13 = vadd.f32 %v979_v6, %v947_v1 }
 0x168   : > { %v1012_v14 = vadd.f32 %v980_v10, %v948_v8 }
 0x169   : > { %1127 = vst [vmem:[%s1914_s30 + $0x50] sm:$0xff] %v1469_v12  ;;  %v826_v15 = vpop.f32.mrb[24].mxu0  ;;  %v906_v16 = vpop.f32.mrb[24].mxu1 }
 0x16a   : > { %v1470_v17 = vpack.c.bf16 %v1012_v14, %v1011_v13  ;;  %v949_v18 = vmax.f32 %v826_v15, 0.0  ;;  %v1144_v19 = vadd.f32 %v1143_v2, %v826_v15  ;;  %v981_v20 = vmax.f32 %v906_v16, 0.0  ;;  %v828_v21 = vpop.f32.mrb[25].mxu0  ;;  %v908_v22 = vpop.f32.mrb[25].mxu1 }
 0x16b   : > { %v1209_v23 = vadd.f32 %v1208_v7, %v906_v16  ;;  %v950_v24 = vmax.f32 %v828_v21, 0.0  ;;  %v1165_v25 = vadd.f32 %v1164_v9, %v828_v21  ;;  %v982_v26 = vmax.f32 %v908_v22, 0.0  ;;  %v830_v27 = vpop.f32.mrb[26].mxu0  ;;  %v910_v28 = vpop.f32.mrb[26].mxu1 }
 0x16c   : > { %1128 = vst [vmem:[%s1914_s30 + $0x58] sm:$0xff] %v1470_v17  ;;  %v1013_v29 = vadd.f32 %v981_v20, %v949_v18  ;;  %v1230_v30 = vadd.f32 %v1229_v11, %v908_v22  ;;  %v951_v31 = vmax.f32 %v830_v27, 0.0  ;;  %v1145_v32 = vadd.f32 %v1144_v19, %v830_v27  ;;  %v832_v33 = vpop.f32.mrb[27].mxu0  ;;  %v912_v34 = vpop.f32.mrb[27].mxu1 }
 0x16d   : > { %v1014_v35 = vadd.f32 %v982_v26, %v950_v24  ;;  %v983_v36 = vmax.f32 %v910_v28, 0.0  ;;  %v1210_v37 = vadd.f32 %v1209_v23, %v910_v28  ;;  %v952_v38 = vmax.f32 %v832_v33, 0.0 }
 0x16e   : > { %v1166_v39 = vadd.f32 %v1165_v25, %v832_v33  ;;  %v984_v40 = vmax.f32 %v912_v34, 0.0  ;;  %v1231_v41 = vadd.f32 %v1230_v30, %v912_v34  ;;  %v1652_v17 = vmov 1966171168  }
 0x16f   : > { %v1471_v42 = vpack.c.bf16 %v1014_v35, %v1013_v29  ;;  %v1015_v43 = vadd.f32 %v983_v36, %v951_v31  ;;  %v1179_v18 = vunpack.c.l.s4 %v1652_v17  ;;  %v1181_v19 = vlaneseq }
 0x170   : > { %v1016_v44 = vadd.f32 %v984_v40, %v952_v38 }
 0x171   : > { %1129 = vst [vmem:[%s1914_s30 + $0x60] sm:$0xff] %v1471_v42  ;;  %v836_v45 = vpop.f32.mrb[28].mxu0  ;;  %v916_v46 = vpop.f32.mrb[28].mxu1  ;;  %v1180_v29 = vunpack.c.0.s8 %v1179_v18  ;;  %vm1195_vm0 = vcmp.lt.s32.totalorder %v1181_v19, 256 }
 0x172   : > { %v1472_v47 = vpack.c.bf16 %v1016_v44, %v1015_v43  ;;  %v953_v48 = vmax.f32 %v836_v45, 0.0  ;;  %v1146_v49 = vadd.f32 %v1145_v32, %v836_v45  ;;  %v985_v50 = vmax.f32 %v916_v46, 0.0  ;;  %v838_v51 = vpop.f32.mrb[29].mxu0  ;;  %v918_v52 = vpop.f32.mrb[29].mxu1 }
 0x173   : > { %v1211_v53 = vadd.f32 %v1210_v37, %v916_v46  ;;  %v954_v54 = vmax.f32 %v838_v51, 0.0  ;;  %v1167_v55 = vadd.f32 %v1166_v39, %v838_v51  ;;  %v986_v56 = vmax.f32 %v918_v52, 0.0  ;;  %v840_v57 = vpop.f32.mrb[30].mxu0  ;;  %v920_v58 = vpop.f32.mrb[30].mxu1 }
 0x174   : > { %1130 = vst [vmem:[%s1914_s30 + $0x68] sm:$0xff] %v1472_v47  ;;  %v1017_v59 = vadd.f32 %v985_v50, %v953_v48  ;;  %v1232_v60 = vadd.f32 %v1231_v41, %v918_v52  ;;  %v955_v61 = vmax.f32 %v840_v57, 0.0  ;;  %v1147_v62 = vadd.f32 %v1146_v49, %v840_v57  ;;  %v842_v63 = vpop.f32.mrb[31].mxu0  ;;  %v922_v0 = vpop.f32.mrb[31].mxu1 }
 0x175   : > { %v1018_v1 = vadd.f32 %v986_v56, %v954_v54  ;;  %v987_v2 = vmax.f32 %v920_v58, 0.0  ;;  %v1212_v3 = vadd.f32 %v1211_v53, %v920_v58  ;;  %v956_v4 = vmax.f32 %v842_v63, 0.0 }
 0x176   : > { %v1148_v5 = vrot.slane %v1147_v62, 4  ;;  %v1168_v6 = vadd.f32 %v1167_v55, %v842_v63  ;;  %v988_v7 = vmax.f32 %v922_v0, 0.0  ;;  %v1233_v8 = vadd.f32 %v1232_v60, %v922_v0 }
 0x177   : > { %v1473_v9 = vpack.c.bf16 %v1018_v1, %v1017_v59  ;;  %v1019_v10 = vadd.f32 %v987_v2, %v955_v61  ;;  %v1213_v11 = vrot.slane %v1212_v3, 4  ;;  %v1182_v32 = vshrl.u32 %v1181_v19, 7 }
 0x178   : > { %v1149_v12 = vadd.f32 %v1148_v5, %v1147_v62  ;;  %v1169_v13 = vrot.slane %v1168_v6, 4  ;;  %v1020_v14 = vadd.f32 %v988_v7, %v956_v4  ;;  %v1234_v15 = vrot.slane %v1233_v8, 4 }
 0x179   : > { %1131 = vst [vmem:[%s1914_s30 + $0x70] sm:$0xff] %v1473_v9  ;;  %v1214_v16 = vadd.f32 %v1213_v11, %v1212_v3  ;;  %v1183_v40 = vsub.s32 %v1180_v29, %v1182_v32 }
 0x17a   : > { %v1150_v20 = vrot.slane %v1149_v12, 2  ;;  %v1170_v21 = vadd.f32 %v1169_v13, %v1168_v6  ;;  %v1474_v22 = vpack.c.bf16 %v1020_v14, %v1019_v10  ;;  %v1235_v23 = vadd.f32 %v1234_v15, %v1233_v8 }
 0x17b   : > { %v1215_v24 = vrot.slane %v1214_v16, 2 }
 0x17c   : > { %v1151_v25 = vadd.f32 %v1150_v20, %v1149_v12  ;;  %v1171_v26 = vrot.slane %v1170_v21, 2  ;;  %1132 = vst [vmem:[%s1914_s30 + $0x78] sm:$0xff] %v1474_v22  ;;  %v1236_v27 = vrot.slane %v1235_v23, 2 }
 0x17d   : > { %v1216_v28 = vadd.f32 %v1215_v24, %v1214_v16 }
 0x17e   : > { %v1152_v30 = vrot.slane %v1151_v25, 1  ;;  %v1172_v31 = vadd.f32 %v1171_v26, %v1170_v21  ;;  %v1237_v33 = vadd.f32 %v1236_v27, %v1235_v23 }
 0x17f   : > { %v1217_v34 = vrot.slane %v1216_v28, 1 }
 0x180   : > { %v1153_v35 = vadd.f32 %v1152_v30, %v1151_v25  ;;  %v1173_v36 = vrot.slane %v1172_v31, 1  ;;  %v1238_v37 = vrot.slane %v1237_v33, 1 }
 0x181   : > { %v1218_v38 = vadd.f32 %v1217_v34, %v1216_v28 }
 0x182   : > { %v1174_v39 = vadd.f32 %v1173_v36, %v1172_v31  ;;  %v1239_v41 = vadd.f32 %v1238_v37, %v1237_v33 }
 0x184   : > { %v1177_v42 = vcombine.low %v1153_v35, %v1174_v39  ;;  %v1242_v43 = vcombine.low %v1218_v38, %v1239_v41 }
 0x186   : > { %v1184_v44 = vrot.slane %v1177_v42, %v1183_v40  ;;  %v1249_v45 = vrot.slane %v1242_v43, %v1183_v40 }
 0x188   : > { %v1191_v46 = vrot.slane %v1184_v44, %v1183_v40  ;;  %v1256_v47 = vrot.slane %v1249_v45, %v1183_v40 }
 0x18a   : > { %1197 = vst.msk [vmem:[%s340_s7] ss:$2 sm:$0x3] %vm1195_vm0, %v1191_v46  ;;  %1452 = vst.msk [vmem:[%s340_s7 + $0x1] ss:$2 sm:$0x3] %vm1195_vm0, %v1256_v47 }
 0x18b PF: > { %p11_p10 = scmp.ge.s32.totalorder %s1692_s16, 4   ;;  %s1951_s12 = smov %s1646_s13 }
 0x18c   : > { %s1952_s13 = smov %s1701_s19  ;;  %s1953_s14 = smov %s1692_s16 }
 0x18d   :  { %13 = sbr.rel (!%p11_p10) target bundleno = 2 (0x2), region = 114 }

</bundles_post_ra>
